<compile_context>
chip_gen: v5e
topology: v5e:2x2
jax: 0.10.0
libtpu: 0.0.40
codegen_flags: <defaults>
</compile_context>

<pallas_src>
import functools

import jax
import jax.numpy as jnp
from jax import lax
from jax.experimental import pallas as pl
from jax.experimental.pallas import tpu as pltpu

_INV_SQRT2 = 0.7071067811865476        # 1/sqrt(2), hoisted
_SQRT_2_OVER_PI = 0.7978845608028654   # sqrt(2/pi), for tanh-approx GELU


def _gelu(h, approximate):
    if approximate:
        # tanh-approximate GELU: transcendental runs on the EUP (separate VLIW slot).
        return 0.5 * h * (1.0 + jnp.tanh(_SQRT_2_OVER_PI * (h + 0.044715 * (h * h * h))))
    # exact erf form (torch.nn.GELU default)
    return 0.5 * h * (1.0 + lax.erf(h * _INV_SQRT2))


# ----------------------------------------------------------------------------- kernels
def _ffn_kernel_out_acc(x_ref, w1_ref, b1_ref, w2_ref, b2_ref, o_ref, *, approximate):
    """f32-output variant: accumulate partial products directly into the resident o_ref."""
    j = pl.program_id(1)

    h = jnp.dot(x_ref[...], w1_ref[...], preferred_element_type=jnp.float32)
    h = h + b1_ref[...].astype(jnp.float32)
    h = _gelu(h, approximate)
    p = jnp.dot(h.astype(w2_ref.dtype), w2_ref[...], preferred_element_type=jnp.float32)

    @pl.when(j == 0)
    def _():
        o_ref[...] = p

    @pl.when(j != 0)
    def _():
        o_ref[...] += p

    @pl.when(j == pl.num_programs(1) - 1)
    def _():
        o_ref[...] += b2_ref[...].astype(o_ref.dtype)


def _ffn_kernel_scratch_acc(x_ref, w1_ref, b1_ref, w2_ref, b2_ref, o_ref, acc_ref, *,
                            approximate):
    """Low-precision-output variant: f32 scratch accumulator, downcast on the final step."""
    j = pl.program_id(1)

    @pl.when(j == 0)
    def _():
        acc_ref[...] = jnp.zeros_like(acc_ref)

    h = jnp.dot(x_ref[...], w1_ref[...], preferred_element_type=jnp.float32)
    h = h + b1_ref[...].astype(jnp.float32)
    h = _gelu(h, approximate)
    acc_ref[...] += jnp.dot(h.astype(w2_ref.dtype), w2_ref[...],
                            preferred_element_type=jnp.float32)

    @pl.when(j == pl.num_programs(1) - 1)
    def _():
        o_ref[...] = (acc_ref[...] + b2_ref[...].astype(jnp.float32)).astype(o_ref.dtype)


# ----------------------------------------------------------------------------- helpers
def _round_up(x, m):
    return (x + m - 1) // m * m


def _tpu_hw_info():
    """(vmem_capacity_bytes, num_tensorcores_per_chip). Conservative fallbacks."""
    kind = ""
    try:
        kind = jax.devices()[0].device_kind.lower()
    except Exception:
        pass
    vmem_bytes = None
    try:
        info = pltpu.get_tpu_info()
        vmem_bytes = int(getattr(info, "vmem_capacity_bytes"))
    except Exception:
        vmem_bytes = None
    if vmem_bytes is None or vmem_bytes <= 0:
        # v5e / v6e: 128 MiB per TensorCore; v7x: 64 MiB. Conservative when unknown.
        vmem_bytes = 128 * 1024 * 1024 if ("v5" in kind or "v6" in kind) else 64 * 1024 * 1024
    num_cores = 2 if ("v7" in kind or "7x" in kind) else 1
    return vmem_bytes, num_cores


def _choose_th(hidden, th_cap):
    """Pick hidden tile (mult of 128, prefer 256) minimizing zero-padding waste."""
    hid_128 = _round_up(hidden, 128)
    th_cap = max(128, th_cap // 128 * 128)
    if hid_128 <= th_cap:
        return hid_128, hid_128                      # single hidden tile, zero waste
    best_key, best = None, None
    for cand in (1024, 896, 768, 640, 512, 384, 256, 128):
        if cand > th_cap:
            continue
        hid_p = _round_up(hid_128, cand)
        waste = hid_p - hid_128
        key = (waste, 0 if cand % 256 == 0 else 1, -cand)   # min waste, prefer 256-mult, big
        if best_key is None or key < best_key:
            best_key, best = key, (cand, hid_p)
    return best


def _vmem_footprint(tm, th, d_in_p, d_out_p, x_eb, w_eb, out_eb):
    """Resident VMEM bytes: double-buffered tiles + accumulator + in-kernel temporaries."""
    return (2 * tm * d_in_p * x_eb        # x row tile
            + 2 * d_in_p * th * w_eb      # W1 hidden-slice tile
            + 2 * th * w_eb               # b1 slice
            + 2 * th * d_out_p * w_eb     # W2 hidden-slice tile
            + 2 * d_out_p * w_eb          # b2
            + 2 * tm * d_out_p * out_eb   # output tile
            + tm * d_out_p * 4            # f32 accumulator (scratch or in-place)
            + 3 * tm * th * 4             # h (f32) + cast copy + GELU temporaries
            + tm * d_out_p * 4)           # second-dot partial before accumulation


# ----------------------------------------------------------------------------- module
class PallasFFN:
    """Pallas-TPU FeedForwardNetwork. Weights padded once at construction."""

    def __init__(self, w1, b1, w2, b2, *, tm=1024, th=1024,
                 approximate_gelu=False, compute_dtype=None):
        if compute_dtype is not None:
            w1, b1, w2, b2 = (a.astype(compute_dtype) for a in (w1, b1, w2, b2))
        self.d_in, self.hidden = w1.shape
        self.d_out = w2.shape[1]
        self.compute_dtype = compute_dtype
        self.approximate_gelu = bool(approximate_gelu)

        self.vmem_bytes, self.num_cores = _tpu_hw_info()
        # Leave headroom for compiler scratch: ~100 MiB usable on v5e/v6e, ~50 MiB on v7x.
        self.vmem_budget = int(self.vmem_bytes * 0.78)
        self.vmem_limit = self.vmem_budget

        self.d_in_p = _round_up(self.d_in, 128)
        self.d_out_p = _round_up(self.d_out, 128)

        w_eb = jnp.dtype(w1.dtype).itemsize
        x_eb = jnp.dtype(compute_dtype).itemsize if compute_dtype is not None else 4
        out_eb = x_eb

        # --- VMEM-aware (tm, th) selection: keep tm as large as possible (arithmetic
        # intensity w.r.t. weight traffic ~ tm); shrink th first, then tm.
        tm_c = max(8, _round_up(tm, 8))
        th_req = max(128, _round_up(th, 128))
        selected = None
        while selected is None:
            th_cap = th_req
            while True:
                th_c, hid_p_c = _choose_th(self.hidden, th_cap)
                fp = _vmem_footprint(tm_c, th_c, self.d_in_p, self.d_out_p,
                                     x_eb, w_eb, out_eb)
                if fp <= self.vmem_budget:
                    selected = (tm_c, th_c, hid_p_c)
                    break
                if th_c <= 128:
                    break
                th_cap = th_c - 128
            if selected is None:
                if tm_c <= 8:
                    th_c, hid_p_c = _choose_th(self.hidden, 128)
                    selected = (tm_c, th_c, hid_p_c)   # last resort; compiler may spill
                else:
                    tm_c = max(8, tm_c // 2)
        self.tm_max, self.th, self.hid_p = selected

        # --- pad weights ONCE (lane-dense 128-multiples); skip pads that are no-ops.
        hid_pad = self.hid_p - self.hidden
        in_pad = self.d_in_p - self.d_in
        out_pad = self.d_out_p - self.d_out
        self.w1_p = w1 if (in_pad == 0 and hid_pad == 0) else jnp.pad(w1, ((0, in_pad), (0, hid_pad)))
        self.b1_p = b1.reshape(1, -1) if hid_pad == 0 else jnp.pad(b1.reshape(1, -1), ((0, 0), (0, hid_pad)))
        self.w2_p = w2 if (hid_pad == 0 and out_pad == 0) else jnp.pad(w2, ((0, hid_pad), (0, out_pad)))
        self.b2_p = b2.reshape(1, -1) if out_pad == 0 else jnp.pad(b2.reshape(1, -1), ((0, 0), (0, out_pad)))
        self.w1_p, self.b1_p, self.w2_p, self.b2_p = jax.block_until_ready(
            (self.w1_p, self.b1_p, self.w2_p, self.b2_p))

    def __call__(self, x):
        orig_shape = x.shape
        if self.compute_dtype is not None:
            x = x.astype(self.compute_dtype)
        out_dtype = x.dtype

        x2d = x.reshape(-1, self.d_in)
        m = x2d.shape[0]

        tm = min(self.tm_max, _round_up(m, 8))
        if self.num_cores >= 2 and m > 8:
            # v7x megacore: guarantee >=2 row tiles so both TensorCores get work.
            tm = min(tm, _round_up(-(-m // 2), 8))
        m_p = _round_up(m, tm)

        pad_rows, pad_cols = m_p - m, self.d_in_p - self.d_in
        if pad_rows or pad_cols:
            x2d = jnp.pad(x2d, ((0, pad_rows), (0, pad_cols)))

        grid = (m_p // tm, self.hid_p // self.th)
        use_scratch = jnp.dtype(out_dtype) != jnp.float32
        if use_scratch:
            kernel = functools.partial(_ffn_kernel_scratch_acc, approximate=self.approximate_gelu)
            scratch_shapes = [pltpu.VMEM((tm, self.d_out_p), jnp.float32)]
        else:
            kernel = functools.partial(_ffn_kernel_out_acc, approximate=self.approximate_gelu)
            scratch_shapes = []

        # b1 stays a per-step (1, th) BlockSpec DMA (tiny); in-kernel dynamic lane
        # slicing of a resident full b1 was considered and skipped for lowering safety.
        out2d = pl.pallas_call(
            kernel,
            out_shape=jax.ShapeDtypeStruct((m_p, self.d_out_p), out_dtype),
            grid_spec=pltpu.PrefetchScalarGridSpec(
                num_scalar_prefetch=0,
                grid=grid,
                in_specs=[
                    pl.BlockSpec((tm, self.d_in_p), lambda i, j: (i, 0)),       # x row tile
                    pl.BlockSpec((self.d_in_p, self.th), lambda i, j: (0, j)),  # W1 slice
                    pl.BlockSpec((1, self.th), lambda i, j: (0, j)),            # b1 slice
                    pl.BlockSpec((self.th, self.d_out_p), lambda i, j: (j, 0)),  # W2 slice
                    pl.BlockSpec((1, self.d_out_p), lambda i, j: (0, 0)),       # b2
                ],
                out_specs=pl.BlockSpec((tm, self.d_out_p), lambda i, j: (i, 0)),
                scratch_shapes=scratch_shapes,
            ),
            compiler_params=pltpu.CompilerParams(
                dimension_semantics=("parallel", "arbitrary"),
                vmem_limit_bytes=self.vmem_limit,
            ),
        )(x2d, self.w1_p, self.b1_p, self.w2_p, self.b2_p)

        return out2d[:m, :self.d_out].reshape(*orig_shape[:-1], self.d_out)


def ffn_reference(x, w1, b1, w2, b2):
    h = jnp.dot(x, w1) + b1
    h = 0.5 * h * (1.0 + lax.erf(h * _INV_SQRT2))
    return jnp.dot(h, w2) + b2


if __name__ == "__main__":
    key = jax.random.PRNGKey(0)

    def make_case(key, batch, seq, input_dim, hidden_dim, output_dim):
        kx, k1, kb1, k2, kb2 = jax.random.split(key, 5)
        x = jax.random.normal(kx, (batch, seq, input_dim), dtype=jnp.float32)
        lim1 = (6.0 / (input_dim + hidden_dim)) ** 0.5
        lim2 = (6.0 / (hidden_dim + output_dim)) ** 0.5
        w1 = jax.random.uniform(k1, (input_dim, hidden_dim), jnp.float32, -lim1, lim1)
        b1 = jax.random.uniform(kb1, (hidden_dim,), jnp.float32, -0.1, 0.1)
        w2 = jax.random.uniform(k2, (hidden_dim, output_dim), jnp.float32, -lim2, lim2)
        b2 = jax.random.uniform(kb2, (output_dim,), jnp.float32, -0.1, 0.1)
        return x, w1, b1, w2, b2

    k_a, k_b = jax.random.split(key)

    # Case 1: small dims (pads every feature dim to 128 lanes, single hidden tile).
    x, w1, b1, w2, b2 = make_case(k_a, 2, 8, 32, 64, 32)
    ffn = PallasFFN(w1, b1, w2, b2)
    out = jax.block_until_ready(ffn(x))
    ref = ffn_reference(x, w1, b1, w2, b2)
    assert out.shape == (2, 8, 32)
    assert jnp.allclose(out, ref, atol=1e-5, rtol=1e-5), "mismatch vs reference (case 1)"

    # Case 2: non-tile-divisible rows, forced multi-tile hidden axis (th=128 -> 3 H tiles),
    # exercises the accumulate-into-output f32 path.
    x, w1, b1, w2, b2 = make_case(k_b, 3, 5, 48, 384, 96)
    ffn = PallasFFN(w1, b1, w2, b2, th=128)
    out = jax.block_until_ready(ffn(x))
    ref = ffn_reference(x, w1, b1, w2, b2)
    assert out.shape == (3, 5, 96)
    assert jnp.allclose(out, ref, atol=1e-5, rtol=1e-5), "mismatch vs reference (case 2)"

    # Case 3: bf16 compute path (f32 scratch accumulator kernel + final downcast).
    ffn_bf16 = PallasFFN(w1, b1, w2, b2, th=128, compute_dtype=jnp.bfloat16)
    out_bf16 = jax.block_until_ready(ffn_bf16(x))
    ref_bf16 = ffn_reference(
        x.astype(jnp.bfloat16).astype(jnp.float32),
        w1.astype(jnp.bfloat16).astype(jnp.float32),
        b1.astype(jnp.bfloat16).astype(jnp.float32),
        w2.astype(jnp.bfloat16).astype(jnp.float32),
        b2.astype(jnp.bfloat16).astype(jnp.float32))
    assert out_bf16.dtype == jnp.bfloat16
    assert jnp.allclose(out_bf16.astype(jnp.float32), ref_bf16, atol=3e-2, rtol=3e-2), \
        "mismatch vs reference (case 3, bf16)"

    print("KERNEL_OK")
</pallas_src>

<mosaic_0001>
module attributes {stable_mosaic.version = 11 : i64} {
  func.func @_ffn_kernel_out_acc(%arg0: i32, %arg1: i32, %arg2: memref<16x128xf32, #tpu.memory_space<vmem>>, %arg3: memref<128x128xf32, #tpu.memory_space<vmem>>, %arg4: memref<1x128xf32, #tpu.memory_space<vmem>>, %arg5: memref<128x128xf32, #tpu.memory_space<vmem>>, %arg6: memref<1x128xf32, #tpu.memory_space<vmem>>, %arg7: memref<16x128xf32, #tpu.memory_space<vmem>>) attributes {dimension_semantics = [#tpu.dimension_semantics<parallel>, #tpu.dimension_semantics<arbitrary>], iteration_bounds = array<i64: 1, 1>, scalar_prefetch = 0 : i64, scratch_operands = 0 : i64, tpu.core_type = #tpu.core_type<tc>, window_params = [{transform_indices = @transform_0, window_bounds = array<i64: 16, 128>}, {transform_indices = @transform_1, window_bounds = array<i64: 128, 128>}, {transform_indices = @transform_2, window_bounds = array<i64: 1, 128>}, {transform_indices = @transform_3, window_bounds = array<i64: 128, 128>}, {pipeline_mode = #tpu.pipeline_mode<synchronous>, transform_indices = @transform_4, window_bounds = array<i64: 1, 128>}, {transform_indices = @transform_5, window_bounds = array<i64: 16, 128>}]} {
    %c0 = arith.constant 0 : index
    %c0_0 = arith.constant 0 : index
    %0 = vector.load %arg2[%c0, %c0_0] : memref<16x128xf32, #tpu.memory_space<vmem>>, vector<16x128xf32>
    %c0_1 = arith.constant 0 : index
    %c0_2 = arith.constant 0 : index
    %1 = vector.load %arg3[%c0_1, %c0_2] : memref<128x128xf32, #tpu.memory_space<vmem>>, vector<128x128xf32>
    %cst = arith.constant dense<0.000000e+00> : vector<16x128xf32>
    %2 = tpu.matmul %0, %1, %cst {dimension_numbers = #tpu.dot_dimension_numbers<[1], [0], [0], [1], [0, 0, 1, 1], [], []>} : vector<16x128xf32>, vector<128x128xf32>, vector<16x128xf32> -> vector<16x128xf32>
    %c0_3 = arith.constant 0 : index
    %c0_4 = arith.constant 0 : index
    %3 = vector.load %arg4[%c0_3, %c0_4] : memref<1x128xf32, #tpu.memory_space<vmem>>, vector<1x128xf32>
    %4 = vector.broadcast %3 : vector<1x128xf32> to vector<16x128xf32>
    %5 = arith.addf %2, %4 : vector<16x128xf32>
    %cst_5 = arith.constant 5.000000e-01 : f32
    %6 = vector.broadcast %cst_5 : f32 to vector<16x128xf32>
    %7 = arith.mulf %6, %5 : vector<16x128xf32>
    %cst_6 = arith.constant 0.707106769 : f32
    %8 = vector.broadcast %cst_6 : f32 to vector<16x128xf32>
    %9 = arith.mulf %5, %8 : vector<16x128xf32>
    %10 = math.erf %9 : vector<16x128xf32>
    %cst_7 = arith.constant 1.000000e+00 : f32
    %11 = vector.broadcast %cst_7 : f32 to vector<16x128xf32>
    %12 = arith.addf %11, %10 : vector<16x128xf32>
    %13 = arith.mulf %7, %12 : vector<16x128xf32>
    %c0_8 = arith.constant 0 : index
    %c0_9 = arith.constant 0 : index
    %14 = vector.load %arg5[%c0_8, %c0_9] : memref<128x128xf32, #tpu.memory_space<vmem>>, vector<128x128xf32>
    %cst_10 = arith.constant dense<0.000000e+00> : vector<16x128xf32>
    %15 = tpu.matmul %13, %14, %cst_10 {dimension_numbers = #tpu.dot_dimension_numbers<[1], [0], [0], [1], [0, 0, 1, 1], [], []>} : vector<16x128xf32>, vector<128x128xf32>, vector<16x128xf32> -> vector<16x128xf32>
    %c0_i32 = arith.constant 0 : i32
    %16 = arith.cmpi eq, %arg1, %c0_i32 : i32
    %17 = arith.extui %16 : i1 to i32
    %c0_i32_11 = arith.constant 0 : i32
    %18 = arith.cmpi ne, %17, %c0_i32_11 : i32
    scf.if %18 {
      %c0_16 = arith.constant 0 : index
      %c0_17 = arith.constant 0 : index
      %25 = vector.load %arg7[%c0_16, %c0_17] : memref<16x128xf32, #tpu.memory_space<vmem>>, vector<16x128xf32>
      tpu.vector_store %arg7[%c0_16, %c0_17], %15 {strides = array<i32>} : memref<16x128xf32, #tpu.memory_space<vmem>>, vector<16x128xf32>,
    } else {
    }
    %c0_i32_12 = arith.constant 0 : i32
    %19 = arith.cmpi ne, %arg1, %c0_i32_12 : i32
    %20 = arith.extui %19 : i1 to i32
    %c0_i32_13 = arith.constant 0 : i32
    %21 = arith.cmpi ne, %20, %c0_i32_13 : i32
    scf.if %21 {
      %c0_16 = arith.constant 0 : index
      %c0_17 = arith.constant 0 : index
      %25 = vector.load %arg7[%c0_16, %c0_17] : memref<16x128xf32, #tpu.memory_space<vmem>>, vector<16x128xf32>
      %26 = arith.addf %25, %15 : vector<16x128xf32>
      %c0_18 = arith.constant 0 : index
      %c0_19 = arith.constant 0 : index
      %27 = vector.load %arg7[%c0_18, %c0_19] : memref<16x128xf32, #tpu.memory_space<vmem>>, vector<16x128xf32>
      tpu.vector_store %arg7[%c0_18, %c0_19], %26 {strides = array<i32>} : memref<16x128xf32, #tpu.memory_space<vmem>>, vector<16x128xf32>,
    } else {
    }
    %c0_i32_14 = arith.constant 0 : i32
    %22 = arith.cmpi eq, %arg1, %c0_i32_14 : i32
    %23 = arith.extui %22 : i1 to i32
    %c0_i32_15 = arith.constant 0 : i32
    %24 = arith.cmpi ne, %23, %c0_i32_15 : i32
    scf.if %24 {
      %c0_16 = arith.constant 0 : index
      %c0_17 = arith.constant 0 : index
      %25 = vector.load %arg7[%c0_16, %c0_17] : memref<16x128xf32, #tpu.memory_space<vmem>>, vector<16x128xf32>
      %c0_18 = arith.constant 0 : index
      %c0_19 = arith.constant 0 : index
      %26 = vector.load %arg6[%c0_18, %c0_19] : memref<1x128xf32, #tpu.memory_space<vmem>>, vector<1x128xf32>
      %27 = vector.broadcast %26 : vector<1x128xf32> to vector<16x128xf32>
      %28 = arith.addf %25, %27 : vector<16x128xf32>
      %c0_20 = arith.constant 0 : index
      %c0_21 = arith.constant 0 : index
      %29 = vector.load %arg7[%c0_20, %c0_21] : memref<16x128xf32, #tpu.memory_space<vmem>>, vector<16x128xf32>
      tpu.vector_store %arg7[%c0_20, %c0_21], %28 {strides = array<i32>} : memref<16x128xf32, #tpu.memory_space<vmem>>, vector<16x128xf32>,
    } else {
    }
    return
  }
  func.func @transform_0(%arg0: i32, %arg1: i32) -> (i32, i32) {
    %c0_i32 = arith.constant 0 : i32
    %c0_i32_0 = arith.constant 0 : i32
    return %arg0, %c0_i32 : i32, i32
  }
  func.func @transform_1(%arg0: i32, %arg1: i32) -> (i32, i32) {
    %c0_i32 = arith.constant 0 : i32
    %c0_i32_0 = arith.constant 0 : i32
    return %c0_i32, %arg1 : i32, i32
  }
  func.func @transform_2(%arg0: i32, %arg1: i32) -> (i32, i32) {
    %c0_i32 = arith.constant 0 : i32
    %c0_i32_0 = arith.constant 0 : i32
    return %c0_i32, %arg1 : i32, i32
  }
  func.func @transform_3(%arg0: i32, %arg1: i32) -> (i32, i32) {
    %c0_i32 = arith.constant 0 : i32
    %c0_i32_0 = arith.constant 0 : i32
    return %arg1, %c0_i32 : i32, i32
  }
  func.func @transform_4(%arg0: i32, %arg1: i32) -> (i32, i32) {
    %c0_i32 = arith.constant 0 : i32
    %c0_i32_0 = arith.constant 0 : i32
    %c0_i32_1 = arith.constant 0 : i32
    return %c0_i32, %c0_i32_0 : i32, i32
  }
  func.func @transform_5(%arg0: i32, %arg1: i32) -> (i32, i32) {
    %c0_i32 = arith.constant 0 : i32
    %c0_i32_0 = arith.constant 0 : i32
    return %arg0, %c0_i32 : i32, i32
  }
}

</mosaic_0001>

<bundles_post_ra>
// kernel: tpu_custom_call.1
= control target key start
LH: loop header
LB: loop body
LE: loop exit
PB: predicated region body
PF: predicated region fallthrough
CT: control target
= control target key end

     0   :  { %10 = vsyncpa [#allocation3], 0  ;;  %s533_s0 = inlined_call_operand.hbm [shape: f32[16,128], index: 0, kind: input, shape index: {}]   ;;  %s534_s1 = inlined_call_operand.hbm [shape: f32[128,128], index: 1, kind: input, shape index: {}]   ;;  %s535_s2 = inlined_call_operand.vmem [shape: f32[1,128], index: 2, kind: input, shape index: {}]   ;;  %s536_s3 = inlined_call_operand.hbm [shape: f32[128,128], index: 3, kind: input, shape index: {}]   ;;  %s537_s4 = inlined_call_operand.vmem [shape: f32[1,128], index: 4, kind: input, shape index: {}]   ;;  %s538_s5 = inlined_call_operand.hbm [shape: f32[16,128], index: 5, kind: output, shape index: {}]  }
   0x1   :  { %11 = vsyncpa [#allocation6], 0 }
   0x2   :  { %12 = vsyncpa [#allocation4], 0  ;;  %s30_s20 = sshll.u32 %s534_s1, 4  ;;  %s437_s21 = smov [#allocation5]   ;;  %s31_s20 = int_to_ptr.hbm [resolvable:$true] %s30_s20 }
   0x3   :  { %s32_s22 = sshll.u32 %s437_s21, 4  ;;  %s17_s25 = sshll.u32 %s533_s0, 4  ;;  %s33_s22 = int_to_ptr.vmem [resolvable:$true] %s32_s22  ;;  %s18_s25 = int_to_ptr.hbm [resolvable:$true] %s17_s25 }
   0x4   :  { %s438_s26 = smov 128   ;;  %s439_s27 = smov 8  }
   0x5   :  { %38 = dma.hbm_to_vmem [thread:$0]  %s31_s20, 2048, %s33_s22, [#allocation6], %s438_s26, %s438_s26, %s439_s27  }
   0x6   :  { %s440_s28 = smov [#allocation2]   ;;  %s45_s1 = sshll.u32 %s536_s3, 4  ;;  %s46_s1 = int_to_ptr.hbm [resolvable:$true] %s45_s1 }
   0x7   :  { %s19_s29 = sshll.u32 %s440_s28, 4  ;;  %s441_s0 = smov [#allocation7]   ;;  %s20_s29 = int_to_ptr.vmem [resolvable:$true] %s19_s29 }
   0x8   :  { %25 = dma.hbm_to_vmem [thread:$0]  %s18_s25, 256, %s20_s29, [#allocation3], %s438_s26, %s438_s26, %s439_s27  }
   0x9   :  { %s47_s7 = sshll.u32 %s441_s0, 4  ;;  %s48_s7 = int_to_ptr.vmem [resolvable:$true] %s47_s7 }
   0xa   :  { %53 = dma.hbm_to_vmem [thread:$0]  %s46_s1, 2048, %s48_s7, [#allocation6], %s438_s26, %s438_s26, %s439_s27  }
   0xb   :  { %431 = dma.done.wait [#allocation3], 256  }
   0xc   :  { %432 = vsyncadd [#allocation3], 4294967040 }
   0xd   :  { %433 = dma.done.wait [#allocation6], 4096  }
   0xe   :  { %434 = vsyncadd [#allocation6], 4294963200  ;;  %v85_v0 = vld [vmem:[#allocation5 + $0x78] sm:$0xff]  ;;  %v84_v1 = vld [vmem:[#allocation5 + $0x70] sm:$0xff]  ;;  %s442_s10 = smov [#allocation8]   ;;  %s275_s14 = sshll.u32 %s538_s5, 4  ;;  %s276_s14 = int_to_ptr.hbm [resolvable:$true] %s275_s14 }
   0xf   :  { %90 = vmatpush.msra.mxu0 %v85_v0  ;;  %291 = vmatpush.msra.mxu2 %v85_v0  ;;  %v83_v2 = vld [vmem:[#allocation5 + $0x68] sm:$0xff]  ;;  %v82_v3 = vld [vmem:[#allocation5 + $0x60] sm:$0xff]  ;;  %v81_v4 = vld [vmem:[#allocation5 + $0x58] sm:$0xff]  ;;  %s273_s11 = sshll.u32 %s442_s10, 4  ;;  %s274_s11 = int_to_ptr.vmem [resolvable:$true] %s273_s11 }
  0x10   :  { %v80_v5 = vld [vmem:[#allocation5 + $0x50] sm:$0xff]  ;;  %v79_v6 = vld [vmem:[#allocation5 + $0x48] sm:$0xff]  ;;  %v78_v7 = vld [vmem:[#allocation5 + $0x40] sm:$0xff] }
  0x11   :  { %91 = vmatpush.msra.mxu0 %v84_v1  ;;  %292 = vmatpush.msra.mxu2 %v84_v1  ;;  %v77_v8 = vld [vmem:[#allocation5 + $0x38] sm:$0xff]  ;;  %v76_v9 = vld [vmem:[#allocation5 + $0x30] sm:$0xff]  ;;  %v75_v10 = vld [vmem:[#allocation5 + $0x28] sm:$0xff] }
  0x12   :  { %v74_v11 = vld [vmem:[#allocation5 + $0x20] sm:$0xff]  ;;  %v73_v12 = vld [vmem:[#allocation5 + $0x18] sm:$0xff]  ;;  %v72_v13 = vld [vmem:[#allocation5 + $0x10] sm:$0xff] }
  0x13   :  { %92 = vmatpush.msra.mxu0 %v83_v2  ;;  %293 = vmatpush.msra.mxu2 %v83_v2  ;;  %v71_v14 = vld [vmem:[#allocation5 + $0x8] sm:$0xff]  ;;  %v70_v15 = vld [vmem:[#allocation5] sm:$0xff]  ;;  %v68_v16 = vld [vmem:[#allocation2] sm:$0xff] }
  0x14   :  { %v69_v17 = vld [vmem:[#allocation2 + $0x8] sm:$0xff]  ;;  %v215_v19 = vld [vmem:[#allocation7 + $0x70] sm:$0xff]  ;;  %v214_v20 = vld [vmem:[#allocation7 + $0x68] sm:$0xff] }
  0x15   :  { %93 = vmatpush.msra.mxu0 %v82_v3  ;;  %294 = vmatpush.msra.mxu2 %v82_v3  ;;  %v216_v18 = vld [vmem:[#allocation7 + $0x78] sm:$0xff]  ;;  %v213_v21 = vld [vmem:[#allocation7 + $0x60] sm:$0xff]  ;;  %v329_v22 = vld [vmem:[%s535_s2] ss:$0 sm:$0xff] }
  0x16   :  { %217 = vmatpush.msra.mxu1 %v216_v18  ;;  %307 = vmatpush.msra.mxu3 %v216_v18  ;;  %v212_v23 = vld [vmem:[#allocation7 + $0x58] sm:$0xff]  ;;  %v211_v25 = vld [vmem:[#allocation7 + $0x50] sm:$0xff]  ;;  %v210_v27 = vld [vmem:[#allocation7 + $0x48] sm:$0xff] }
  0x17   :  { %94 = vmatpush.msra.mxu0 %v81_v4  ;;  %295 = vmatpush.msra.mxu2 %v81_v4  ;;  %v209_v29 = vld [vmem:[#allocation7 + $0x40] sm:$0xff]  ;;  %v208_v30 = vld [vmem:[#allocation7 + $0x38] sm:$0xff]  ;;  %v207_v33 = vld [vmem:[#allocation7 + $0x30] sm:$0xff] }
  0x18   :  { %218 = vmatpush.msra.mxu1 %v215_v19  ;;  %308 = vmatpush.msra.mxu3 %v215_v19  ;;  %v206_v36 = vld [vmem:[#allocation7 + $0x28] sm:$0xff]  ;;  %v205_v39 = vld [vmem:[#allocation7 + $0x20] sm:$0xff]  ;;  %v204_v43 = vld [vmem:[#allocation7 + $0x18] sm:$0xff] }
  0x19   :  { %95 = vmatpush.msra.mxu0 %v80_v5  ;;  %296 = vmatpush.msra.mxu2 %v80_v5  ;;  %v203_v47 = vld [vmem:[#allocation7 + $0x10] sm:$0xff]  ;;  %v202_v52 = vld [vmem:[#allocation7 + $0x8] sm:$0xff]  ;;  %v201_v56 = vld [vmem:[#allocation7] sm:$0xff] }
  0x1a   :  { %219 = vmatpush.msra.mxu1 %v214_v20  ;;  %309 = vmatpush.msra.mxu3 %v214_v20 }
  0x1b   :  { %96 = vmatpush.msra.mxu0 %v79_v6  ;;  %297 = vmatpush.msra.mxu2 %v79_v6 }
  0x1c   :  { %220 = vmatpush.msra.mxu1 %v213_v21  ;;  %310 = vmatpush.msra.mxu3 %v213_v21 }
  0x1d   :  { %97 = vmatpush.msra.mxu0 %v78_v7  ;;  %298 = vmatpush.msra.mxu2 %v78_v7 }
  0x1e   :  { %221 = vmatpush.msra.mxu1 %v212_v23  ;;  %311 = vmatpush.msra.mxu3 %v212_v23 }
  0x1f   :  { %98 = vmatpush.msra.mxu0 %v77_v8  ;;  %299 = vmatpush.msra.mxu2 %v77_v8 }
  0x20   :  { %222 = vmatpush.msra.mxu1 %v211_v25  ;;  %312 = vmatpush.msra.mxu3 %v211_v25 }
  0x21   :  { %99 = vmatpush.msra.mxu0 %v76_v9  ;;  %300 = vmatpush.msra.mxu2 %v76_v9 }
  0x22   :  { %223 = vmatpush.msra.mxu1 %v210_v27  ;;  %313 = vmatpush.msra.mxu3 %v210_v27 }
  0x23   :  { %100 = vmatpush.msra.mxu0 %v75_v10  ;;  %301 = vmatpush.msra.mxu2 %v75_v10 }
  0x24   :  { %224 = vmatpush.msra.mxu1 %v209_v29  ;;  %314 = vmatpush.msra.mxu3 %v209_v29 }
  0x25   :  { %101 = vmatpush.msra.mxu0 %v74_v11  ;;  %302 = vmatpush.msra.mxu2 %v74_v11 }
  0x26   :  { %225 = vmatpush.msra.mxu1 %v208_v30  ;;  %315 = vmatpush.msra.mxu3 %v208_v30 }
  0x27   :  { %102 = vmatpush.msra.mxu0 %v73_v12  ;;  %303 = vmatpush.msra.mxu2 %v73_v12 }
  0x28   :  { %226 = vmatpush.msra.mxu1 %v207_v33  ;;  %316 = vmatpush.msra.mxu3 %v207_v33 }
  0x29   :  { %103 = vmatpush.msra.mxu0 %v72_v13  ;;  %304 = vmatpush.msra.mxu2 %v72_v13 }
  0x2a   :  { %227 = vmatpush.msra.mxu1 %v206_v36  ;;  %317 = vmatpush.msra.mxu3 %v206_v36 }
  0x2b   :  { %104 = vmatpush.msra.mxu0 %v71_v14  ;;  %305 = vmatpush.msra.mxu2 %v71_v14 }
  0x2c   :  { %228 = vmatpush.msra.mxu1 %v205_v39  ;;  %318 = vmatpush.msra.mxu3 %v205_v39 }
  0x2d   :  { %105 = vmatpush.msra.mxu0 %v70_v15  ;;  %306 = vmatpush.msra.mxu2 %v70_v15 }
  0x2e   :  { %106 = vmatmul.f32.vlgmr.msra.gmra.mxu0 %v68_v16  ;;  %109 = vmatmul.f32.vlgmr.msra.gmra.mxu2 %v69_v17 }
  0x2f   :  { %229 = vmatpush.msra.mxu1 %v204_v43  ;;  %319 = vmatpush.msra.mxu3 %v204_v43 }
  0x31   :  { %230 = vmatpush.msra.mxu1 %v203_v47  ;;  %320 = vmatpush.msra.mxu3 %v203_v47 }
  0x33   :  { %231 = vmatpush.msra.mxu1 %v202_v52  ;;  %321 = vmatpush.msra.mxu3 %v202_v52 }
  0x35   :  { %232 = vmatpush.msra.mxu1 %v201_v56  ;;  %322 = vmatpush.msra.mxu3 %v201_v56  ;;  %v330_v56 = vld [vmem:[%s537_s4] ss:$0 sm:$0xff] }
  0xab   :  { %v107_v24 = vpop.f32.mrf.mxu0 }
  0xac   :  { %v494_v26 = vadd.f32 %v329_v22, %v107_v24 }
  0xae   :  { %v497_v28 = vmul.f32 0.70710677, %v494_v26  ;;  %v113_v47 = vmul.f32 0.5, %v494_v26 }
  0xb0   :  { %v117_v31 = vmul.f32 %v497_v28, %v497_v28 }
  0xb1   :  { %v110_v32 = vpop.f32.mrf.mxu2 }
  0xb2   :  { %v501_v34 = vmin.f32 %v117_v31, 16.0  ;;  %v503_v35 = vadd.f32 %v329_v22, %v110_v32 }
  0xb4   :  { %v119_v37 = vmul.f32 2.1237322e-06, %v501_v34  ;;  %v507_v38 = vmul.f32 0.70710677, %v503_v35  ;;  %v130_v40 = vmul.f32 3.8918573e-05, %v501_v34 }
  0xb6   :  { %v120_v41 = vadd.f32 0.00028619796, %v119_v37  ;;  %v157_v42 = vmul.f32 %v507_v38, %v507_v38  ;;  %v131_v44 = vadd.f32 0.001143296, %v130_v40 }
  0xb8   :  { %v121_v45 = vmul.f32 %v120_v41, %v501_v34  ;;  %v158_v46 = vmin.f32 %v157_v42, 16.0  ;;  %v132_v48 = vmul.f32 %v131_v44, %v501_v34 }
  0xba   :  { %v159_v49 = vmul.f32 2.1237322e-06, %v158_v46  ;;  %v170_v50 = vmul.f32 3.8918573e-05, %v158_v46  ;;  %v122_v51 = vadd.f32 0.0036580483, %v121_v45 }
  0xbb   :  { %v133_v53 = vadd.f32 0.014752088, %v132_v48 }
  0xbc   :  { %v160_v54 = vadd.f32 0.00028619796, %v159_v49  ;;  %v171_v55 = vadd.f32 0.001143296, %v170_v50  ;;  %v123_v60 = vmul.f32 %v122_v51, %v501_v34 }
  0xbd   :  { %v134_v57 = vmul.f32 %v133_v53, %v501_v34  ;;  %v114_v53 = vmul.f32 0.5, %v503_v35 }
  0xbe   :  { %v161_v58 = vmul.f32 %v160_v54, %v158_v46  ;;  %v172_v59 = vmul.f32 %v171_v55, %v158_v46  ;;  %v124_v2 = vadd.f32 0.05243302, %v123_v60 }
  0xbf   :  { %v135_v61 = vadd.f32 0.112945676, %v134_v57 }
  0xc0   :  { %v162_v62 = vadd.f32 0.0036580483, %v161_v58  ;;  %v173_v63 = vadd.f32 0.014752088, %v172_v59  ;;  %v125_v8 = vmul.f32 %v124_v2, %v501_v34 }
  0xc1   :  { %v136_v0 = vmul.f32 %v135_v61, %v501_v34 }
  0xc2   :  { %v174_v1 = vmul.f32 %v173_v63, %v158_v46  ;;  %v163_v4 = vmul.f32 %v162_v62, %v158_v46  ;;  %v126_v13 = vadd.f32 0.18741608, %v125_v8 }
  0xc3   :  { %v137_v3 = vadd.f32 0.4994258, %v136_v0 }
  0xc4   :  { %v175_v5 = vadd.f32 0.112945676, %v174_v1  ;;  %v164_v10 = vadd.f32 0.05243302, %v163_v4  ;;  %v127_v17 = vmul.f32 %v126_v13, %v501_v34 }
  0xc5   :  { %v138_v6 = vmul.f32 %v137_v3, %v501_v34 }
  0xc6   :  { %v176_v7 = vmul.f32 %v175_v5, %v158_v46  ;;  %v165_v14 = vmul.f32 %v164_v10, %v158_v46  ;;  %v128_v21 = vadd.f32 1.1283791, %v127_v17 }
  0xc7   :  { %v139_v9 = vadd.f32 1.0, %v138_v6 }
  0xc8   :  { %v177_v11 = vadd.f32 0.4994258, %v176_v7  ;;  %v166_v18 = vadd.f32 0.18741608, %v165_v14  ;;  %v129_v31 = vmul.f32 %v128_v21, %v497_v28 }
  0xc9   :  { %331 = vrcp.f32 %v139_v9  ;;  %v151_v22 = vand.u32 2147483648, %v139_v9  ;;  %v149_v27 = vand.u32 2147483647, %v139_v9  ;;  %vm145_vm1 = vweird.f32 %v139_v9 }
  0xca   :  { %v178_v12 = vmul.f32 %v177_v11, %v158_v46  ;;  %v167_v24 = vmul.f32 %v166_v18, %v158_v46 }
  0xcb   :  { %v152_v32 = vor.u32 1.1754944e-38, %v151_v22  ;;  %vm150_vm3 = vcmp.eq.f32.partialorder %v149_v27, 8.507059e+37 }
  0xcc   :  { %v179_v15 = vadd.f32 1.0, %v178_v12  ;;  %v168_v36 = vadd.f32 1.1283791, %v167_v24 }
  0xce   :  { %333 = vrcp.f32 %v179_v15  ;;  %v191_v37 = vand.u32 2147483648, %v179_v15  ;;  %v189_v41 = vand.u32 2147483647, %v179_v15  ;;  %vm185_vm5 = vweird.f32 %v179_v15 }
  0xcf   :  { %v332_v16 = vpop.eup %331  ;;  %v169_v46 = vmul.f32 %v168_v36, %v507_v38 }
  0xd0   :  { %v141_v19 = vmul.f32 %v332_v16, %v139_v9  ;;  %vm146_vm0 = vweird.f32 %v332_v16  ;;  %v192_v45 = vor.u32 1.1754944e-38, %v191_v37  ;;  %vm190_vm7 = vcmp.eq.f32.partialorder %v189_v41, 8.507059e+37 }
  0xd1   :  { %vm147_vm2 = vmor %vm145_vm1, %vm146_vm0 }
  0xd2   :  { %v142_v20 = vsub.f32 1.0, %v141_v19 }
  0xd4   :  { %v334_v23 = vpop.eup %333  ;;  %v143_v25 = vmul.f32 %v332_v16, %v142_v20 }
  0xd5   :  { %v181_v29 = vmul.f32 %v334_v23, %v179_v15  ;;  %vm186_vm4 = vweird.f32 %v334_v23 }
  0xd6   :  { %v144_v30 = vadd.f32 %v332_v16, %v143_v25  ;;  %vm187_vm6 = vmor %vm185_vm5, %vm186_vm4 }
  0xd7   :  { %v182_v33 = vsub.f32 1.0, %v181_v29 }
  0xd8   :  { %v148_v34 = vsel %vm147_vm2, %v332_v16, %v144_v30 }
  0xd9   :  { %v153_v39 = vsel %vm150_vm3, %v152_v32, %v148_v34  ;;  %v183_v40 = vmul.f32 %v334_v23, %v182_v33 }
  0xda   :  { %v154_v42 = vmul.f32 %v153_v39, %v129_v31 }
  0xdb   :  { %v184_v43 = vadd.f32 %v334_v23, %v183_v40 }
  0xdc   :  { %v289_v44 = vclamps-f32 %v154_v42, 1.0 }
  0xdd   :  { %v188_v28 = vsel %vm187_vm6, %v334_v23, %v184_v43 }
  0xde   :  { %v197_v48 = vadd.f32 1.0, %v289_v44  ;;  %v193_v49 = vsel %vm190_vm7, %v192_v45, %v188_v28 }
  0xdf   :  { %v194_v50 = vmul.f32 %v193_v49, %v169_v46 }
  0xe0   :  { %v199_v51 = vmul.f32 %v197_v48, %v113_v47 }
  0xe1   :  { %v290_v52 = vclamps-f32 %v194_v50, 1.0 }
  0xe2   :  { %233 = vmatmul.f32.vlgmr.msra.gmra.mxu1 %v199_v51 }
  0xe3   :  { %v198_v54 = vadd.f32 1.0, %v290_v52 }
  0xe5   :  { %v200_v55 = vmul.f32 %v198_v54, %v114_v53 }
  0xe7   :  { %236 = vmatmul.f32.vlgmr.msra.gmra.mxu3 %v200_v55 }
 0x15f   :  { %v234_v38 = vpop.f32.mrf.mxu1 }
 0x160   :  { %v265_v57 = vadd.f32 %v330_v56, %v234_v38 }
 0x162   :  { %267 = vst [vmem:[#allocation8] sm:$0xff] %v265_v57 }
 0x16a   :  { %v237_v26 = vpop.f32.mrf.mxu3 }
 0x16b   :  { %v266_v58 = vadd.f32 %v330_v56, %v237_v26 }
 0x16d   :  { %268 = vst [vmem:[#allocation8 + $0x8] sm:$0xff] %v266_v58 }
 0x16e   :  { %281 = dma.vmem_to_hbm [thread:$0]  %s274_s11, 256, %s276_s14, [#allocation4], %s438_s26, %s438_s26, %s439_s27  }
 0x16f   :  { %435 = dma.done.wait [#allocation4], 256  }
 0x170   :  { %436 = vsyncadd [#allocation4], 4294967040 }
 0x171   :  { %286 = vsyncpa [#allocation3], 1 }
 0x172   :  { %287 = vsyncpa [#allocation6], 1 }
 0x173   :  { %288 = vsyncpa [#allocation4], 1 }

</bundles_post_ra>
